<compile_context>
chip_gen: v6e
topology: v6e:2x2x1
jax: 0.10.0
libtpu: 0.0.40
codegen_flags: <defaults>
</compile_context>

<pallas_src>
import jax
import jax.numpy as jnp
from jax.experimental import pallas as pl
from jax.experimental.pallas import tpu as pltpu


def _round_up(n, m):
    return ((n + m - 1) // m) * m


def _make_kernel(rc, n_chunks, compute_dtype):
    """Kernel over one (tb, D) x tile, tb == n_chunks * rc rows."""

    def kernel(x_ref, w1_ref, b1_ref, w2_ref, b2_ref, o_ref):
        # Weights are VMEM-resident; hoist the loads out of the chunk loop.
        w1 = w1_ref[...]                 # [D, H]
        b1 = b1_ref[...]                 # [1, H] f32
        w2 = w2_ref[...]                 # [1, H] f32
        b2 = b2_ref[0]                   # scalar bias from SMEM

        # Statically-unrolled row sub-chunks: keeps the live [rc, H] f32 h small
        # (<= ~256 KiB) while the DMA'd x tile can be multi-MiB, and keeps all
        # output-store offsets static (lane-dense unmasked vst).
        for c in range(n_chunks):
            r0 = c * rc
            xc = x_ref[pl.ds(r0, rc), :]                         # [rc, D]
            if compute_dtype is not None and xc.dtype != compute_dtype:
                xc = xc.astype(compute_dtype)                    # in-kernel cast only
            h = jnp.dot(xc, w1, preferred_element_type=jnp.float32)  # MXU, f32 acc
            h = jnp.maximum(h + b1, 0.0)                         # bias + ReLU (VPU)
            # Second layer (H -> 1): VPU multiply + XLU lane reduction (avoids an
            # N=1 MXU matmul); result relaid out to a lane-dense (1, rc) row.
            y = jnp.sum(h * w2, axis=-1) + b2                    # [rc] f32
            o_ref[:, pl.ds(r0, rc)] = y.reshape(1, rc).astype(o_ref.dtype)

    return kernel


# Cache whether CORE_PARALLEL lowers on this chip/toolchain.
_DIM_SEMANTICS_OK = {}


def regressor_forward(x, w1, b1, w2, b2, *,
                      target_tile_bytes=4 * 1024 * 1024,
                      chunk_rows=512,
                      compute_dtype=None):
    """Regressor forward.

    x: [B, D]; w1: [D, H]; b1: [H] or [1, H]; w2: [H, 1] or [H]; b2 scalar-like.
    Returns [B, 1] float32.
    """
    B, D = x.shape
    H = w1.shape[1]
    assert w1.shape == (D, H)

    # Normalize parameter shapes/dtypes (bias/ReLU/reduction math stays f32).
    b1 = jnp.asarray(b1, jnp.float32).reshape(1, H)
    w2_row = jnp.asarray(w2, jnp.float32).reshape(1, H)
    b2 = jnp.asarray(b2, jnp.float32).reshape(1)

    # Only the tiny W1 is cast in the wrapper; x is NOT re-written in HBM — it is
    # either consumed in its native dtype or cast per-chunk inside the kernel.
    if compute_dtype is not None:
        w1 = w1.astype(compute_dtype)

    x_itemsize = jnp.dtype(x.dtype).itemsize
    w1_itemsize = jnp.dtype(w1.dtype).itemsize
    # Sublane packing multiple for the x tile: 8 (f32), 16 (bf16), 32 (int8/fp8).
    sub = 8 * max(1, 4 // x_itemsize)

    # ---- Generation-aware VMEM budget. v7x has 64 MiB per TensorCore (the
    # smallest across generations); v5e/v6e have 128 MiB physical.
    try:
        vmem_cap = int(pltpu.get_tpu_info().vmem_capacity_bytes)
    except Exception:
        vmem_cap = 64 * 1024 * 1024
    vmem_budget = int(vmem_cap * 0.55)                     # headroom for compiler scratch
    vmem_limit = int(min(vmem_cap - (8 << 20), vmem_budget + (16 << 20)))

    def vmem_need(t, r):
        x_bytes = 2 * t * D * x_itemsize                   # double-buffered x tiles
        out_bytes = 2 * t * 4                              # double-buffered (1, t) f32 out
        w_bytes = D * H * w1_itemsize + 2 * H * 4          # resident W1, b1, w2
        inter = 3 * r * H * 4 + r * D * 4                  # h, h*w2 / acc, cast x chunk
        return x_bytes + out_bytes + w_bytes + inter

    # ---- Byte-targeted batch tile (kernel is HBM-read-bound on x).
    row_bytes = D * x_itemsize
    rows_target = max(sub, target_tile_bytes // row_bytes)

    if rows_target >= B:
        # A single tile covers the whole batch.
        tb = _round_up(max(B, 1), sub)
        rc = min(max(chunk_rows, sub), tb)
        rc = max(sub, (rc // sub) * sub)
        if tb % rc:
            tb = _round_up(tb, rc)                          # padded rows are discarded
    else:
        # Multi-tile: rc a multiple of 128 so tb is lane-dense for the (1, tb)
        # output row and sublane-packed for bf16/int8 x tiles.
        rc = max(128, (min(max(chunk_rows, 128), rows_target) // 128) * 128)
        rc = _round_up(rc, sub)
        tb = _round_up(rows_target, rc)

    # Shrink the tile until the (intermediate-aware) estimate fits the budget.
    while tb > rc and vmem_need(tb, rc) > vmem_budget:
        tb = max(rc, _round_up(tb // 2, rc))

    # Cap the number of statically-unrolled in-kernel chunks (code size).
    max_chunks = 32
    if tb > rc * max_chunks:
        tb = rc * max_chunks

    nb = pl.cdiv(B, tb)
    if nb > 1 and tb % 128 != 0:
        # Keep the (1, tb) output block lane-dense when there are multiple tiles.
        rc = _round_up(rc, 128)
        tb = _round_up(tb, rc)
        nb = pl.cdiv(B, tb)

    n_chunks = tb // rc
    b_pad = nb * tb

    flops = 2 * b_pad * D * H + 4 * b_pad * H
    bytes_accessed = (b_pad * D * x_itemsize + D * H * w1_itemsize
                      + 2 * H * 4 + 4 + b_pad * 4)

    kernel = _make_kernel(rc, n_chunks, compute_dtype)

    def build(dim_sem):
        return pl.pallas_call(
            kernel,
            out_shape=jax.ShapeDtypeStruct((1, b_pad), jnp.float32),
            grid_spec=pltpu.PrefetchScalarGridSpec(
                num_scalar_prefetch=0,
                grid=(nb,),
                in_specs=[
                    pl.BlockSpec((tb, D), lambda i: (i, 0)),    # x: tiled over batch
                    pl.BlockSpec((D, H), lambda i: (0, 0)),     # W1: VMEM-resident
                    pl.BlockSpec((1, H), lambda i: (0, 0)),     # b1: VMEM-resident
                    pl.BlockSpec((1, H), lambda i: (0, 0)),     # w2 row: VMEM-resident
                    pl.BlockSpec(memory_space=pltpu.MemorySpace.SMEM),  # b2 scalar
                ],
                out_specs=pl.BlockSpec((1, tb), lambda i: (0, i)),       # lane-dense row
            ),
            compiler_params=pltpu.CompilerParams(
                dimension_semantics=dim_sem,
                vmem_limit_bytes=vmem_limit),
            cost_estimate=pl.CostEstimate(
                flops=flops, transcendentals=0, bytes_accessed=bytes_accessed),
        )

    # Batch tiles are fully independent. On v7x CORE_PARALLEL splits the grid
    # across both TensorCores (plain "parallel" is a measured no-op); fall back
    # to "arbitrary" on chips/toolchains where it is not supported.
    core_parallel = getattr(pltpu, "CORE_PARALLEL", None)
    sem_list = [("arbitrary",)]
    if (nb > 1 and core_parallel is not None
            and _DIM_SEMANTICS_OK.get("core_parallel", True)):
        sem_list.insert(0, (core_parallel,))

    last_err = None
    for idx, sem in enumerate(sem_list):
        is_core_parallel = core_parallel is not None and sem[0] is core_parallel
        try:
            out = build(sem)(x, w1, b1, w2_row, b2)
            out = jax.block_until_ready(out)
            if is_core_parallel:
                _DIM_SEMANTICS_OK["core_parallel"] = True
            return out[0, :B].reshape(B, 1)
        except Exception as e:  # fall back to the next dimension semantics
            last_err = e
            if is_core_parallel:
                _DIM_SEMANTICS_OK["core_parallel"] = False
            if idx == len(sem_list) - 1:
                raise
    raise last_err


if __name__ == "__main__":
    key = jax.random.PRNGKey(0)
    k_x, k_w1, k_b1, k_w2, k_b2 = jax.random.split(key, 5)

    input_dim = 32   # Regressor(input_dim)
    H = 128          # nn.Linear(input_dim, 128)

    w1 = jax.random.normal(k_w1, (input_dim, H), dtype=jnp.float32) * 0.1
    b1 = jax.random.normal(k_b1, (H,), dtype=jnp.float32) * 0.1
    w2 = jax.random.normal(k_w2, (H, 1), dtype=jnp.float32) * 0.1
    b2 = jax.random.normal(k_b2, (1,), dtype=jnp.float32) * 0.1

    def ref_fn(xv, w1v):
        h = jnp.dot(xv.astype(jnp.float32), w1v.astype(jnp.float32),
                    precision=jax.lax.Precision.HIGHEST)
        h = jnp.maximum(h + b1.reshape(1, H), 0.0)
        return jnp.sum(h * w2.reshape(1, H), axis=-1, keepdims=True) + b2.reshape(1, 1)

    # Case 1: tiny batch -> single tile, single chunk, f32.
    x_small = jax.random.normal(k_x, (8, input_dim), dtype=jnp.float32)
    out = regressor_forward(x_small, w1, b1, w2, b2)
    jax.block_until_ready(out)
    assert out.shape == (8, 1)
    assert jnp.allclose(out, ref_fn(x_small, w1), atol=1e-4, rtol=1e-4)

    # Case 2: single tile, multiple in-kernel row chunks (tile padded to chunk mult).
    x_mid = jax.random.normal(k_x, (300, input_dim), dtype=jnp.float32)
    out = regressor_forward(x_mid, w1, b1, w2, b2, chunk_rows=128)
    jax.block_until_ready(out)
    assert out.shape == (300, 1)
    assert jnp.allclose(out, ref_fn(x_mid, w1), atol=1e-4, rtol=1e-4)

    # Case 3: multiple batch tiles + multiple chunks per tile (small byte target
    # forces tiling; defaults would use one multi-MiB tile for this batch).
    x_big = jax.random.normal(k_x, (2000, input_dim), dtype=jnp.float32)
    out = regressor_forward(x_big, w1, b1, w2, b2,
                            target_tile_bytes=96 * 1024, chunk_rows=256)
    jax.block_until_ready(out)
    assert out.shape == (2000, 1)
    assert jnp.allclose(out, ref_fn(x_big, w1), atol=1e-4, rtol=1e-4)

    # Case 4: bf16 MXU operands (x cast per-tile in the kernel; accumulation f32).
    out_bf16 = regressor_forward(x_big, w1, b1, w2, b2,
                                 target_tile_bytes=96 * 1024,
                                 compute_dtype=jnp.bfloat16)
    jax.block_until_ready(out_bf16)
    ref_bf16 = ref_fn(x_big.astype(jnp.bfloat16), w1.astype(jnp.bfloat16))
    assert jnp.allclose(out_bf16, ref_bf16, atol=5e-3, rtol=5e-3)

    print("KERNEL_OK")
</pallas_src>

<mosaic_0001>
module attributes {stable_mosaic.version = 11 : i64} {
  func.func @kernel(%arg0: i32, %arg1: memref<8x32xf32, #tpu.memory_space<vmem>>, %arg2: memref<32x128xf32, #tpu.memory_space<vmem>>, %arg3: memref<1x128xf32, #tpu.memory_space<vmem>>, %arg4: memref<1x128xf32, #tpu.memory_space<vmem>>, %arg5: memref<1xf32, #tpu.memory_space<smem>>, %arg6: memref<1x8xf32, #tpu.memory_space<vmem>>) attributes {dimension_semantics = [#tpu.dimension_semantics<arbitrary>], iteration_bounds = array<i64: 1>, scalar_prefetch = 0 : i64, scratch_operands = 0 : i64, tpu.core_type = #tpu.core_type<tc>, window_params = [{transform_indices = @transform_0, window_bounds = array<i64: 8, 32>}, {pipeline_mode = #tpu.pipeline_mode<synchronous>, transform_indices = @transform_1, window_bounds = array<i64: 32, 128>}, {pipeline_mode = #tpu.pipeline_mode<synchronous>, transform_indices = @transform_2, window_bounds = array<i64: 1, 128>}, {pipeline_mode = #tpu.pipeline_mode<synchronous>, transform_indices = @transform_3, window_bounds = array<i64: 1, 128>}, {transform_indices = @transform_4, window_bounds = array<i64: 1>}, {transform_indices = @transform_5, window_bounds = array<i64: 1, 8>}]} {
    %c0 = arith.constant 0 : index
    %c0_0 = arith.constant 0 : index
    %0 = vector.load %arg2[%c0, %c0_0] : memref<32x128xf32, #tpu.memory_space<vmem>>, vector<32x128xf32>
    %c0_1 = arith.constant 0 : index
    %c0_2 = arith.constant 0 : index
    %1 = vector.load %arg3[%c0_1, %c0_2] : memref<1x128xf32, #tpu.memory_space<vmem>>, vector<1x128xf32>
    %c0_3 = arith.constant 0 : index
    %c0_4 = arith.constant 0 : index
    %2 = vector.load %arg4[%c0_3, %c0_4] : memref<1x128xf32, #tpu.memory_space<vmem>>, vector<1x128xf32>
    %c0_5 = arith.constant 0 : index
    %3 = memref.load %arg5[%c0_5] : memref<1xf32, #tpu.memory_space<smem>>
    %c0_6 = arith.constant 0 : index
    %c0_7 = arith.constant 0 : index
    %4 = vector.load %arg1[%c0_6, %c0_7] : memref<8x32xf32, #tpu.memory_space<vmem>>, vector<8x32xf32>
    %cst = arith.constant dense<0.000000e+00> : vector<8x128xf32>
    %5 = tpu.matmul %4, %0, %cst {dimension_numbers = #tpu.dot_dimension_numbers<[1], [0], [0], [1], [0, 0, 1, 1], [], []>} : vector<8x32xf32>, vector<32x128xf32>, vector<8x128xf32> -> vector<8x128xf32>
    %6 = vector.broadcast %1 : vector<1x128xf32> to vector<8x128xf32>
    %7 = arith.addf %5, %6 : vector<8x128xf32>
    %cst_8 = arith.constant 0.000000e+00 : f32
    %8 = vector.broadcast %cst_8 : f32 to vector<8x128xf32>
    %9 = arith.maximumf %7, %8 : vector<8x128xf32>
    %10 = vector.broadcast %2 : vector<1x128xf32> to vector<8x128xf32>
    %11 = arith.mulf %9, %10 : vector<8x128xf32>
    %cst_9 = arith.constant dense<0.000000e+00> : vector<8xf32>
    %12 = vector.multi_reduction <add>, %11, %cst_9 [1] : vector<8x128xf32> to vector<8xf32>
    %13 = vector.broadcast %3 : f32 to vector<8xf32>
    %14 = arith.addf %12, %13 : vector<8xf32>
    %15 = vector.shape_cast %14 : vector<8xf32> to vector<1x8xf32>
    %c0_10 = arith.constant 0 : index
    %c0_11 = arith.constant 0 : index
    %16 = vector.load %arg6[%c0_10, %c0_11] : memref<1x8xf32, #tpu.memory_space<vmem>>, vector<1x8xf32>
    tpu.vector_store %arg6[%c0_10, %c0_11], %15 {strides = array<i32>} : memref<1x8xf32, #tpu.memory_space<vmem>>, vector<1x8xf32>,
    return
  }
  func.func @transform_0(%arg0: i32) -> (i32, i32) {
    %c0_i32 = arith.constant 0 : i32
    %c0_i32_0 = arith.constant 0 : i32
    return %arg0, %c0_i32 : i32, i32
  }
  func.func @transform_1(%arg0: i32) -> (i32, i32) {
    %c0_i32 = arith.constant 0 : i32
    %c0_i32_0 = arith.constant 0 : i32
    %c0_i32_1 = arith.constant 0 : i32
    return %c0_i32, %c0_i32_0 : i32, i32
  }
  func.func @transform_2(%arg0: i32) -> (i32, i32) {
    %c0_i32 = arith.constant 0 : i32
    %c0_i32_0 = arith.constant 0 : i32
    %c0_i32_1 = arith.constant 0 : i32
    return %c0_i32, %c0_i32_0 : i32, i32
  }
  func.func @transform_3(%arg0: i32) -> (i32, i32) {
    %c0_i32 = arith.constant 0 : i32
    %c0_i32_0 = arith.constant 0 : i32
    %c0_i32_1 = arith.constant 0 : i32
    return %c0_i32, %c0_i32_0 : i32, i32
  }
  func.func @transform_4(%arg0: i32) -> i32 {
    %c0_i32 = arith.constant 0 : i32
    %c0_i32_0 = arith.constant 0 : i32
    return %c0_i32 : i32
  }
  func.func @transform_5(%arg0: i32) -> (i32, i32) {
    %c0_i32 = arith.constant 0 : i32
    %c0_i32_0 = arith.constant 0 : i32
    return %c0_i32, %arg0 : i32, i32
  }
}

</mosaic_0001>

<bundles_post_ra>
// kernel: tpu_custom_call.1
= control target key start
LH: loop header
LB: loop body
LE: loop exit
PB: predicated region body
PF: predicated region fallthrough
CT: control target
= control target key end

     0   :  { %11 = vsyncpa [#allocation4], 0  ;;  %s321_s0 = inlined_call_operand.hbm [shape: f32[8,32], index: 0, kind: input, shape index: {}]   ;;  %s322_s1 = inlined_call_operand.hbm [shape: f32[32,128], index: 1, kind: input, shape index: {}]   ;;  %s323_s2 = inlined_call_operand.vmem [shape: f32[1,128], index: 2, kind: input, shape index: {}]   ;;  %s324_s3 = inlined_call_operand.vmem [shape: f32[1,128], index: 3, kind: input, shape index: {}]   ;;  %s325_s4 = inlined_call_operand.<no memory space> [shape: f32[1], index: 4, kind: input, shape index: {}]   ;;  %s326_s5 = inlined_call_operand.hbm [shape: f32[1,8], index: 5, kind: output, shape index: {}]  }
   0x1   :  { %12 = vsyncpa [#allocation7], 0 }
   0x2   :  { %13 = vsyncpa [#allocation5], 0  ;;  %s266_s18 = smov [#allocation3]   ;;  %s267_s20 = smov [#allocation6]  }
   0x3   :  { %s20_s19 = sshll.u32 %s266_s18, 4  ;;  %s29_s21 = sshll.u32 %s267_s20, 4  ;;  %s21_s19 = int_to_ptr.vmem [resolvable:$true] %s20_s19  ;;  %s30_s21 = int_to_ptr.vmem [resolvable:$true] %s29_s21 }
   0x4   :  { %s208_s22 = scalar_lea.vmem %s21_s19, 128  ;;  %p213_p1 = scmp.lt.s32.totalorder %s21_s19, %s21_s19 }
   0x5   :  { %p209_p0 = scmp.ne.s32.totalorder %s21_s19, %s208_s22  ;;  %p214_p2 = scmp.lt.s32.totalorder %s208_s22, %s208_s22 }
   0x7   :  { %p215_p3 = por %p214_p2, %p213_p1 }
   0x9   :  { %p216_p4 = pnand %p215_p3, %p209_p0 }
   0xb   :  { %219 = shalt.err (!%p216_p4)
}
   0xc   :  { %23 = dma.hbm_to_vmem [thread:$0]  %s321_s0, 128, %s21_s19, [#allocation4]  }
   0xd   :  { %s228_s25 = scalar_lea.vmem %s30_s21, 512  ;;  %p233_p6 = scmp.lt.s32.totalorder %s30_s21, %s30_s21 }
   0xe   :  { %p229_p5 = scmp.ne.s32.totalorder %s30_s21, %s228_s25  ;;  %p234_p7 = scmp.lt.s32.totalorder %s228_s25, %s228_s25 }
  0x10   :  { %p235_p8 = por %p234_p7, %p233_p6 }
  0x12   :  { %p236_p9 = pnand %p235_p8, %p229_p5 }
  0x14   :  { %239 = shalt.err (!%p236_p9)
}
  0x15   :  { %s268_s26 = smov 128   ;;  %s269_s27 = smov 8  }
  0x16   :  { %35 = dma.hbm_to_vmem [thread:$0]  %s322_s1, 512, %s30_s21, [#allocation7], %s268_s26, %s268_s26, %s269_s27  }
  0x17   :  { %260 = dma.done.wait [#allocation4], 128  }
  0x18   :  { %261 = vsyncadd [#allocation4], 4294967168 }
  0x19   :  { %262 = dma.done.wait [#allocation7], 512  }
  0x1a   :  { %263 = vsyncadd [#allocation7], 4294966784  ;;  %v270_v0 = vmov 0.0   ;;  %vm271_vm0 = vmmov 0   ;;  %v51_v1 = vld [vmem:[#allocation6 + $0x18] sm:$0xff]  ;;  %v50_v2 = vld [vmem:[#allocation6 + $0x10] sm:$0xff]  ;;  %v149_v13 = vlaneseq  ;;  %v146_v16 = vstv %s325_s4 }
  0x1b   :  { %182 = vmatprep.subr.mxu0 %v270_v0  ;;  %190 = vmatprep.mubr.msk.f32.mxu0 %vm271_vm0, %v270_v0  ;;  %v49_v3 = vld [vmem:[#allocation6 + $0x8] sm:$0xff]  ;;  %v48_v4 = vld [vmem:[#allocation6] sm:$0xff]  ;;  %v55_v5 = vld [vmem:[#allocation3] sm:$0xff]  ;;  %vm62_vm1 = vcmask 261120   ;;  %vm156_vm2 = vcmask 57344  }
  0x1c   :  { %183 = vmatpush3.msra.mxu0 %v51_v1  ;;  %v174_v6 = vld [vmem:[%s323_s2] ss:$0 sm:$0xff]  ;;  %v150_v14 = vand.u32 127, %v149_v13  ;;  %v152_v15 = vshrl.u32 %v149_v13, 7  ;;  %s272_s2 = smov [#allocation8]  }
  0x1d   :  { %184 = vmatprep.subr.mxu0 %v270_v0  ;;  %v176_v10 = vld [vmem:[%s324_s3] ss:$0 sm:$0xff]  ;;  %s164_s9 = sshll.u32 %s272_s2, 4  ;;  %s165_s9 = int_to_ptr.vmem [resolvable:$true] %s164_s9 }
  0x1e   :  { %185 = vmatpush3.msra.mxu0 %v50_v2  ;;  %v153_v17 = vsub.s32 %v150_v14, %v152_v15  ;;  %s240_s3 = scalar_lea.vmem %s165_s9, 16  ;;  %s244_s10 = scalar_lea.vmem %s165_s9, 32 }
  0x1f   :  { %186 = vmatprep.subr.mxu0 %v270_v0  ;;  %p241_p10 = scmp.ne.s32.totalorder %s165_s9, %s240_s3  ;;  %p245_p11 = scmp.lt.s32.totalorder %s165_s9, %s165_s9 }
  0x20   :  { %187 = vmatpush3.msra.mxu0 %v49_v3  ;;  %p246_p12 = scmp.lt.s32.totalorder %s244_s10, %s240_s3 }
  0x21   :  { %188 = vmatprep.subr.mxu0 %v270_v0 }
  0x22   :  { %189 = vmatpush3.msra.mxu0 %v48_v4  ;;  %p247_p13 = por %p246_p12, %p245_p11 }
  0x23   :  { %191 = vmatmul.mubr.msk.f32.vlgmr.msra.gmra.mxu0 %vm62_vm1, %v55_v5 }
  0x24   :  { %p248_p0 = pnand %p247_p13, %p241_p10 }
  0xe3   :  { %v132_v7 = vpop.f32.mrf.mxu0 }
  0xe4   :  { %v133_v8 = vadd.f32 %v174_v6, %v132_v7 }
  0xe5   :  { %v192_v9 = vpop.f32.mrf.mxu0 }
  0xe6   :  { %v136_v11 = vmax.f32 %v133_v8, 0.0 }
  0xe8   :  { %v143_v12 = vmul.f32 %v176_v10, %v136_v11 }
  0xea   :  { %144 = vadd.xlane.f32.xlu0 %v143_v12 }
 0x173   :  { %v145_v18 = vpop.xlane.xlu0 %144 }
 0x174   :  { %v147_v19 = vadd.f32 %v146_v16, %v145_v18 }
 0x176   :  { %v154_v20 = vrot.slane %v147_v19, %v153_v17 }
 0x178   :  { %157 = vst.msk [vmem:[#allocation8] sm:$0x1] %vm156_vm2, %v154_v20 }
 0x179   :  { %251 = shalt.err (!%p248_p0)
}
 0x17a   :  { %167 = dma.vmem_to_hbm [thread:$0]  %s165_s9, 16, %s326_s5, [#allocation5]  }
 0x17b   :  { %264 = dma.done.wait [#allocation5], 16  }
 0x17c   :  { %265 = vsyncadd [#allocation5], 4294967280 }
 0x17d   :  { %171 = vsyncpa [#allocation4], 1 }
 0x17e   :  { %172 = vsyncpa [#allocation7], 1 }
 0x17f   :  { %173 = vsyncpa [#allocation5], 1 }

</bundles_post_ra>
